<compile_context>
chip_gen: v7x
topology: tpu7x:2x2x1
jax: 0.10.0
libtpu: 0.0.40
codegen_flags: <defaults>
</compile_context>

<pallas_src>
import functools

import jax
import jax.numpy as jnp
from jax import lax
from jax.experimental import pallas as pl
from jax.experimental.pallas import tpu as pltpu

COS_EPS = 1e-8  # torch.nn.CosineSimilarity default eps
# NOTE: eps is applied per-vector here (||x||^2 clamped at eps), which only
# differs from torch's max(||x||*||y||, eps) for near-zero-norm rows.


def _contrastive_kernel(e1_ref, e2c_ref, diag_ref, out_ref,
                        e1n_sc, m_sc, l_sc, *, inv_temp):
    """One (row-block i, column-block j) grid step.

    e1_ref  : (TM, D) emb1 row block     (block index constant over j -> one DMA)
    e2c_ref : (TN, D) emb2 column block  (streamed over j)
    diag_ref: (TM, 1) f32 precomputed sim[i, i] = cos(e1_i, e2_i) / temp
    out_ref : (TM, 1) per-row loss = logsumexp_j(sim[i, :]) - sim[i, i]
    e1n_sc  : (TM, D) normalized emb1 row block in the MXU dtype (VMEM scratch)
    m_sc,l_sc: (TM, 1) f32 online-softmax accumulators (VMEM scratch)
    """
    j = pl.program_id(1)

    @pl.when(j == 0)
    def _init():
        # Normalize the row block ONCE per row block (hoisted out of the j sweep);
        # fold 1/temp into the scale so the logits tile needs no divides.
        e1f = e1_ref[...].astype(jnp.float32)
        s1 = lax.rsqrt(jnp.maximum(jnp.sum(e1f * e1f, axis=-1, keepdims=True),
                                   COS_EPS))
        e1n_sc[...] = (e1f * (s1 * inv_temp)).astype(e1n_sc.dtype)
        m_sc[...] = jnp.full(m_sc.shape, -jnp.inf, dtype=m_sc.dtype)
        l_sc[...] = jnp.zeros(l_sc.shape, dtype=l_sc.dtype)

    # Normalize the streamed emb2 column block (f32 math, MXU-dtype operand out).
    e2f = e2c_ref[...].astype(jnp.float32)
    s2 = lax.rsqrt(jnp.maximum(jnp.sum(e2f * e2f, axis=-1, keepdims=True), COS_EPS))
    e2n = (e2f * s2).astype(e1n_sc.dtype)

    # Logits tile: contract on D for both operands (A @ B.T form, same as
    # flash-attention q @ k.T -- handled natively by the MXU, no per-step
    # transpose of the (TN, D) block).
    sim = lax.dot_general(e1n_sc[...], e2n, (((1,), (1,)), ((), ())),
                          preferred_element_type=jnp.float32)      # (TM, TN) f32

    # Online logsumexp across column blocks.
    m_prev = m_sc[...]
    m_new = jnp.maximum(m_prev, jnp.max(sim, axis=-1, keepdims=True))
    alpha = jnp.exp(m_prev - m_new)
    l_sc[...] = alpha * l_sc[...] + jnp.sum(jnp.exp(sim - m_new), axis=-1,
                                            keepdims=True)
    m_sc[...] = m_new

    @pl.when(j == pl.num_programs(1) - 1)
    def _finalize():
        out_ref[...] = m_sc[...] + jnp.log(l_sc[...]) - diag_ref[...]


def _vmem_capacity_bytes():
    try:
        return int(pltpu.get_tpu_info().vmem_capacity_bytes)
    except Exception:
        return 64 * 1024 * 1024  # conservative (v7x per-TC VMEM)


def _largest_aligned_divisor(n, align, cap):
    """Largest divisor of n that is a multiple of `align` and <= cap (0 if none)."""
    b = (min(cap, n) // align) * align
    while b >= align:
        if n % b == 0:
            return b
        b -= align
    return 0


def _pick_tiles(B, D, in_sz, mxu_sz, vmem_budget, col_buffers):
    """TM is the big tile (intensity on the re-streamed emb2 ~ 2*TM/in_sz FLOP/B);
    TN stays modest and MXU/lane aligned."""
    pack_m = max(8, 32 // mxu_sz)   # sublane pack: 8 f32, 16 bf16, 32 int8/fp8

    # Column tile: prefer 256 (2x256x256 MXU on v6e/v7x), then 128, then any /8.
    tn = (_largest_aligned_divisor(B, 256, 256)
          or _largest_aligned_divisor(B, 128, 256)
          or _largest_aligned_divisor(B, 8, 512)
          or B)
    # TODO(synk): if B has no multiple-of-8 divisor (e.g. prime B) this falls back
    # to one full-size block; pad/mask the batch instead if such B matter.

    # Row tile: as large as the VMEM budget allows, capped for megacore sharding.
    fixed = col_buffers * tn * D * in_sz + 2 * tn * D * 4   # emb2 window + f32 temps
    per_row = (2 * D * in_sz      # double-buffered emb1 window
               + D * mxu_sz       # normalized row-block scratch
               + D * 4            # one-time f32 upcast temp (j == 0)
               + 8 * tn           # (tm, tn) f32 sim tile + exp temp
               + 32)              # diag/out/m/l rows
    tm_cap = max(pack_m, (vmem_budget - fixed) // per_row)
    tm_cap = min(tm_cap, 1024)
    if B >= 4 * 512:              # keep >= 4 row blocks when tiles can stay >= 512
        tm_cap = min(tm_cap, B // 4)
    elif B >= 2 * pack_m:         # otherwise keep >= 2 for the "parallel" axis
        tm_cap = min(tm_cap, B // 2)
    align_m = 256 if tm_cap >= 256 else pack_m
    tm = (_largest_aligned_divisor(B, align_m, tm_cap)
          or _largest_aligned_divisor(B, pack_m, tm_cap)
          or _largest_aligned_divisor(B, 8, tm_cap)
          or B)
    return int(tm), int(tn)


def _estimate_vmem_bytes(tm, tn, D, in_sz, mxu_sz, col_buffers):
    b = 0
    b += 2 * tm * D * in_sz            # emb1 row window (double-buffered)
    b += col_buffers * tn * D * in_sz  # emb2 column window
    b += 2 * 2 * tm * 4                # diag-in + loss-out windows
    b += tm * D * mxu_sz               # normalized row-block scratch
    b += 2 * tm * 4                    # m / l scratch
    b += tm * D * 4                    # one-time f32 upcast of the emb1 block
    b += 2 * tn * D * 4                # f32 upcast / normalized emb2 temps
    b += 2 * tm * tn * 4               # sim tile + exp temp
    return b


def contrastive_loss(emb1, emb2, temp=0.5, *, block_m=None, block_n=None,
                     use_bf16_matmul=True, col_buffers=2, vmem_budget_bytes=None):
    """emb1, emb2: (B, D) arrays (f32 or bf16). Returns scalar f32 loss."""
    assert emb1.shape == emb2.shape and emb1.ndim == 2
    assert emb1.dtype == emb2.dtype
    B, D = emb1.shape
    inv_temp = float(1.0 / temp)
    in_sz = jnp.dtype(emb1.dtype).itemsize

    # MXU operand dtype: bf16 is native peak on v5e/v6e/v7x; post-normalization
    # values are O(1/temp), so bf16 logits are fine for a loss. Use
    # use_bf16_matmul=False for exact-f32 logits.
    if use_bf16_matmul and emb1.dtype == jnp.float32:
        mxu_dtype = jnp.bfloat16
    else:
        mxu_dtype = emb1.dtype
    mxu_sz = jnp.dtype(mxu_dtype).itemsize

    phys_vmem = _vmem_capacity_bytes()
    if vmem_budget_bytes is None:
        vmem_budget_bytes = min(48 * 1024 * 1024, int(phys_vmem * 0.6))

    tm, tn = _pick_tiles(B, D, in_sz, mxu_sz, vmem_budget_bytes, col_buffers)
    if block_m is not None:
        tm = int(block_m)
    if block_n is not None:
        tn = int(block_n)
    assert B % tm == 0 and B % tn == 0, (B, tm, tn)

    est = _estimate_vmem_bytes(tm, tn, D, in_sz, mxu_sz, col_buffers)
    vmem_limit = int(min(phys_vmem - 2 * 1024 * 1024,
                         max(32 * 1024 * 1024, 2 * est)))

    # Per-row diagonal sim[i, i] = cos(emb1_i, emb2_i) / temp, computed once in
    # f32 (cheap O(B*D)); avoids streaming a second (tm, D) emb2 window.
    e1f = emb1.astype(jnp.float32)
    e2f = emb2.astype(jnp.float32)
    s1 = lax.rsqrt(jnp.maximum(jnp.sum(e1f * e1f, axis=-1, keepdims=True), COS_EPS))
    s2 = lax.rsqrt(jnp.maximum(jnp.sum(e2f * e2f, axis=-1, keepdims=True), COS_EPS))
    diag = jnp.sum((e1f * s1) * (e2f * s2), axis=-1, keepdims=True) * inv_temp

    e2_spec_kwargs = {}
    if col_buffers != 2 and hasattr(pl, "Buffered"):
        e2_spec_kwargs["pipeline_mode"] = pl.Buffered(col_buffers)

    grid = (B // tm, B // tn)
    cost = pl.CostEstimate(
        flops=2 * B * B * D + 6 * B * D,
        transcendentals=B * B,
        bytes_accessed=(B * D * in_sz              # emb1 read once
                        + grid[0] * B * D * in_sz  # emb2 re-streamed per row block
                        + 2 * B * 4))              # diag in + per-row loss out

    kernel = functools.partial(_contrastive_kernel, inv_temp=inv_temp)
    per_row = pl.pallas_call(
        kernel,
        out_shape=jax.ShapeDtypeStruct((B, 1), jnp.float32),
        grid_spec=pltpu.PrefetchScalarGridSpec(
            num_scalar_prefetch=0,
            grid=grid,
            in_specs=[
                pl.BlockSpec((tm, D), lambda i, j: (i, 0)),      # emb1 row block
                pl.BlockSpec((tn, D), lambda i, j: (j, 0),       # emb2 column block
                             **e2_spec_kwargs),
                pl.BlockSpec((tm, 1), lambda i, j: (i, 0)),      # diag rows
            ],
            out_specs=pl.BlockSpec((tm, 1), lambda i, j: (i, 0)),
            scratch_shapes=[pltpu.VMEM((tm, D), mxu_dtype),      # normalized emb1
                            pltpu.VMEM((tm, 1), jnp.float32),    # m
                            pltpu.VMEM((tm, 1), jnp.float32)],   # l
        ),
        compiler_params=pltpu.CompilerParams(
            dimension_semantics=("parallel", "arbitrary"),
            vmem_limit_bytes=vmem_limit),
        cost_estimate=cost,
    )(emb1, emb2, diag)

    # Mean over the batch (labels = arange(B), CrossEntropyLoss 'mean' reduction).
    return jnp.mean(per_row)


def _reference(emb1, emb2, temp=0.5):
    # Pure-JAX reference with torch semantics.
    e1 = emb1.astype(jnp.float32)
    e2 = emb2.astype(jnp.float32)
    dots = e1 @ e2.T
    n1 = jnp.linalg.norm(e1, axis=-1, keepdims=True)
    n2 = jnp.linalg.norm(e2, axis=-1, keepdims=True)
    sim = dots / jnp.maximum(n1 * n2.T, COS_EPS) / temp
    lse = jax.scipy.special.logsumexp(sim, axis=-1)
    diag = jnp.diagonal(sim)
    return jnp.mean(lse - diag)


if __name__ == "__main__":
    key = jax.random.PRNGKey(0)
    k1, k2 = jax.random.split(key)
    B, D = 32, 64
    emb1 = jax.random.normal(k1, (B, D), dtype=jnp.float32)
    emb2 = jax.random.normal(k2, (B, D), dtype=jnp.float32)

    ref = _reference(emb1, emb2, temp=0.5)

    # Exact-f32 path with small explicit blocks so both grid axes are exercised
    # (grid = (4, 2)).
    loss_f32 = contrastive_loss(emb1, emb2, temp=0.5, block_m=8, block_n=16,
                                use_bf16_matmul=False)
    loss_f32 = jax.block_until_ready(loss_f32)
    assert jnp.allclose(loss_f32, ref, rtol=1e-5, atol=1e-5), (loss_f32, ref)

    # Default path: auto tiles + bf16 MXU operands (looser tolerance).
    loss_bf16 = contrastive_loss(emb1, emb2, temp=0.5)
    loss_bf16 = jax.block_until_ready(loss_bf16)
    assert jnp.allclose(loss_bf16, ref, rtol=0.0, atol=3e-2), (loss_bf16, ref)

    print("KERNEL_OK")
</pallas_src>

<mosaic_0001>
module attributes {stable_mosaic.version = 11 : i64} {
  func.func @_contrastive_kernel(%arg0: i32, %arg1: i32, %arg2: memref<8x64xf32, #tpu.memory_space<vmem>>, %arg3: memref<16x64xf32, #tpu.memory_space<vmem>>, %arg4: memref<8x1xf32, #tpu.memory_space<vmem>>, %arg5: memref<8x1xf32, #tpu.memory_space<vmem>>, %arg6: memref<8x64xf32, #tpu.memory_space<vmem>>, %arg7: memref<8x1xf32, #tpu.memory_space<vmem>>, %arg8: memref<8x1xf32, #tpu.memory_space<vmem>>) attributes {dimension_semantics = [#tpu.dimension_semantics<parallel>, #tpu.dimension_semantics<arbitrary>], iteration_bounds = array<i64: 4, 2>, scalar_prefetch = 0 : i64, scratch_operands = 3 : i64, tpu.core_type = #tpu.core_type<tc>, window_params = [{transform_indices = @transform_0, window_bounds = array<i64: 8, 64>}, {transform_indices = @transform_1, window_bounds = array<i64: 16, 64>}, {transform_indices = @transform_2, window_bounds = array<i64: 8, 1>}, {transform_indices = @transform_3, window_bounds = array<i64: 8, 1>}]} {
    %c0_i32 = arith.constant 0 : i32
    %0 = arith.cmpi eq, %arg1, %c0_i32 : i32
    %1 = arith.extui %0 : i1 to i32
    %c0_i32_0 = arith.constant 0 : i32
    %2 = arith.cmpi ne, %1, %c0_i32_0 : i32
    scf.if %2 {
      %c0_17 = arith.constant 0 : index
      %c0_18 = arith.constant 0 : index
      %33 = vector.load %arg2[%c0_17, %c0_18] : memref<8x64xf32, #tpu.memory_space<vmem>>, vector<8x64xf32>
      %34 = arith.mulf %33, %33 : vector<8x64xf32>
      %cst_19 = arith.constant dense<0.000000e+00> : vector<8xf32>
      %35 = vector.multi_reduction <add>, %34, %cst_19 [1] : vector<8x64xf32> to vector<8xf32>
      %36 = vector.shape_cast %35 : vector<8xf32> to vector<8x1xf32>
      %cst_20 = arith.constant 9.99999993E-9 : f32
      %37 = vector.broadcast %cst_20 : f32 to vector<8x1xf32>
      %38 = arith.maximumf %36, %37 : vector<8x1xf32>
      %39 = math.rsqrt %38 : vector<8x1xf32>
      %cst_21 = arith.constant 2.000000e+00 : f32
      %40 = vector.broadcast %cst_21 : f32 to vector<8x1xf32>
      %41 = arith.mulf %39, %40 : vector<8x1xf32>
      %42 = vector.broadcast %41 : vector<8x1xf32> to vector<8x64xf32>
      %43 = arith.mulf %33, %42 : vector<8x64xf32>
      %c0_22 = arith.constant 0 : index
      %c0_23 = arith.constant 0 : index
      %44 = vector.load %arg6[%c0_22, %c0_23] : memref<8x64xf32, #tpu.memory_space<vmem>>, vector<8x64xf32>
      tpu.vector_store %arg6[%c0_22, %c0_23], %43 {strides = array<i32>} : memref<8x64xf32, #tpu.memory_space<vmem>>, vector<8x64xf32>,
      %cst_24 = arith.constant 0xFF800000 : f32
      %45 = vector.broadcast %cst_24 : f32 to vector<8x1xf32>
      %c0_25 = arith.constant 0 : index
      %c0_26 = arith.constant 0 : index
      %46 = vector.load %arg7[%c0_25, %c0_26] : memref<8x1xf32, #tpu.memory_space<vmem>>, vector<8x1xf32>
      tpu.vector_store %arg7[%c0_25, %c0_26], %45 {strides = array<i32>} : memref<8x1xf32, #tpu.memory_space<vmem>>, vector<8x1xf32>,
      %cst_27 = arith.constant 0.000000e+00 : f32
      %47 = vector.broadcast %cst_27 : f32 to vector<8x1xf32>
      %c0_28 = arith.constant 0 : index
      %c0_29 = arith.constant 0 : index
      %48 = vector.load %arg8[%c0_28, %c0_29] : memref<8x1xf32, #tpu.memory_space<vmem>>, vector<8x1xf32>
      tpu.vector_store %arg8[%c0_28, %c0_29], %47 {strides = array<i32>} : memref<8x1xf32, #tpu.memory_space<vmem>>, vector<8x1xf32>,
    } else {
    }
    %c0 = arith.constant 0 : index
    %c0_1 = arith.constant 0 : index
    %3 = vector.load %arg3[%c0, %c0_1] : memref<16x64xf32, #tpu.memory_space<vmem>>, vector<16x64xf32>
    %4 = arith.mulf %3, %3 : vector<16x64xf32>
    %cst = arith.constant dense<0.000000e+00> : vector<16xf32>
    %5 = vector.multi_reduction <add>, %4, %cst [1] : vector<16x64xf32> to vector<16xf32>
    %6 = vector.shape_cast %5 : vector<16xf32> to vector<16x1xf32>
    %cst_2 = arith.constant 9.99999993E-9 : f32
    %7 = vector.broadcast %cst_2 : f32 to vector<16x1xf32>
    %8 = arith.maximumf %6, %7 : vector<16x1xf32>
    %9 = math.rsqrt %8 : vector<16x1xf32>
    %10 = vector.broadcast %9 : vector<16x1xf32> to vector<16x64xf32>
    %11 = arith.mulf %3, %10 : vector<16x64xf32>
    %c0_3 = arith.constant 0 : index
    %c0_4 = arith.constant 0 : index
    %12 = vector.load %arg6[%c0_3, %c0_4] : memref<8x64xf32, #tpu.memory_space<vmem>>, vector<8x64xf32>
    %cst_5 = arith.constant dense<0.000000e+00> : vector<8x16xf32>
    %13 = tpu.matmul %12, %11, %cst_5 {dimension_numbers = #tpu.dot_dimension_numbers<[1], [1], [0], [0], [0, 0, 1, 0], [], []>} : vector<8x64xf32>, vector<16x64xf32>, vector<8x16xf32> -> vector<8x16xf32>
    %c0_6 = arith.constant 0 : index
    %c0_7 = arith.constant 0 : index
    %14 = vector.load %arg7[%c0_6, %c0_7] : memref<8x1xf32, #tpu.memory_space<vmem>>, vector<8x1xf32>
    %cst_8 = arith.constant dense<0xFF800000> : vector<8xf32>
    %15 = vector.multi_reduction <maximumf>, %13, %cst_8 [1] : vector<8x16xf32> to vector<8xf32>
    %16 = vector.shape_cast %15 : vector<8xf32> to vector<8x1xf32>
    %17 = arith.maximumf %14, %16 : vector<8x1xf32>
    %18 = arith.subf %14, %17 : vector<8x1xf32>
    %19 = math.exp %18 : vector<8x1xf32>
    %c0_9 = arith.constant 0 : index
    %c0_10 = arith.constant 0 : index
    %20 = vector.load %arg8[%c0_9, %c0_10] : memref<8x1xf32, #tpu.memory_space<vmem>>, vector<8x1xf32>
    %21 = arith.mulf %19, %20 : vector<8x1xf32>
    %22 = vector.broadcast %17 : vector<8x1xf32> to vector<8x16xf32>
    %23 = arith.subf %13, %22 : vector<8x16xf32>
    %24 = math.exp %23 : vector<8x16xf32>
    %cst_11 = arith.constant dense<0.000000e+00> : vector<8xf32>
    %25 = vector.multi_reduction <add>, %24, %cst_11 [1] : vector<8x16xf32> to vector<8xf32>
    %26 = vector.shape_cast %25 : vector<8xf32> to vector<8x1xf32>
    %27 = arith.addf %21, %26 : vector<8x1xf32>
    %c0_12 = arith.constant 0 : index
    %c0_13 = arith.constant 0 : index
    %28 = vector.load %arg8[%c0_12, %c0_13] : memref<8x1xf32, #tpu.memory_space<vmem>>, vector<8x1xf32>
    tpu.vector_store %arg8[%c0_12, %c0_13], %27 {strides = array<i32>} : memref<8x1xf32, #tpu.memory_space<vmem>>, vector<8x1xf32>,
    %c0_14 = arith.constant 0 : index
    %c0_15 = arith.constant 0 : index
    %29 = vector.load %arg7[%c0_14, %c0_15] : memref<8x1xf32, #tpu.memory_space<vmem>>, vector<8x1xf32>
    tpu.vector_store %arg7[%c0_14, %c0_15], %17 {strides = array<i32>} : memref<8x1xf32, #tpu.memory_space<vmem>>, vector<8x1xf32>,
    %c1_i32 = arith.constant 1 : i32
    %30 = arith.cmpi eq, %arg1, %c1_i32 : i32
    %31 = arith.extui %30 : i1 to i32
    %c0_i32_16 = arith.constant 0 : i32
    %32 = arith.cmpi ne, %31, %c0_i32_16 : i32
    scf.if %32 {
      %c0_17 = arith.constant 0 : index
      %c0_18 = arith.constant 0 : index
      %33 = vector.load %arg7[%c0_17, %c0_18] : memref<8x1xf32, #tpu.memory_space<vmem>>, vector<8x1xf32>
      %c0_19 = arith.constant 0 : index
      %c0_20 = arith.constant 0 : index
      %34 = vector.load %arg8[%c0_19, %c0_20] : memref<8x1xf32, #tpu.memory_space<vmem>>, vector<8x1xf32>
      %35 = math.log %34 : vector<8x1xf32>
      %36 = arith.addf %33, %35 : vector<8x1xf32>
      %c0_21 = arith.constant 0 : index
      %c0_22 = arith.constant 0 : index
      %37 = vector.load %arg4[%c0_21, %c0_22] : memref<8x1xf32, #tpu.memory_space<vmem>>, vector<8x1xf32>
      %38 = arith.subf %36, %37 : vector<8x1xf32>
      %c0_23 = arith.constant 0 : index
      %c0_24 = arith.constant 0 : index
      %39 = vector.load %arg5[%c0_23, %c0_24] : memref<8x1xf32, #tpu.memory_space<vmem>>, vector<8x1xf32>
      tpu.vector_store %arg5[%c0_23, %c0_24], %38 {strides = array<i32>} : memref<8x1xf32, #tpu.memory_space<vmem>>, vector<8x1xf32>,
    } else {
    }
    return
  }
  func.func @transform_0(%arg0: i32, %arg1: i32) -> (i32, i32) {
    %c0_i32 = arith.constant 0 : i32
    %c0_i32_0 = arith.constant 0 : i32
    return %arg0, %c0_i32 : i32, i32
  }
  func.func @transform_1(%arg0: i32, %arg1: i32) -> (i32, i32) {
    %c0_i32 = arith.constant 0 : i32
    %c0_i32_0 = arith.constant 0 : i32
    return %arg1, %c0_i32 : i32, i32
  }
  func.func @transform_2(%arg0: i32, %arg1: i32) -> (i32, i32) {
    %c0_i32 = arith.constant 0 : i32
    %c0_i32_0 = arith.constant 0 : i32
    return %arg0, %c0_i32 : i32, i32
  }
  func.func @transform_3(%arg0: i32, %arg1: i32) -> (i32, i32) {
    %c0_i32 = arith.constant 0 : i32
    %c0_i32_0 = arith.constant 0 : i32
    return %arg0, %c0_i32 : i32, i32
  }
}

</mosaic_0001>

<bundles_post_ra>
// kernel: tpu_custom_call.1
= control target key start
LH: loop header
LB: loop body
LE: loop exit
PB: predicated region body
PF: predicated region fallthrough
CT: control target
= control target key end

     0   :  { %8 = vsyncpa [#allocation6], 0  ;;  %s927_s0 = inlined_call_operand.vmem [shape: f32[32,64], index: 0, kind: input, shape index: {}]   ;;  %s928_s1 = inlined_call_operand.hbm [shape: f32[32,64], index: 1, kind: input, shape index: {}]   ;;  %s929_s2 = inlined_call_operand.vmem [shape: f32[32,1], index: 2, kind: input, shape index: {}]   ;;  %s930_s3 = inlined_call_operand.vmem [shape: f32[32,1], index: 3, kind: output, shape index: {}]  }
   0x1   :  { %10 = vsyncpa [#allocation6 + $0x1], 0  ;;  %s743_s12 = smov 0   ;;  %s745_s13 = smov 0  }
   0x2   :  { %s747_s14 = smov 0   ;;  %s749_s15 = smov 0  }
   0x3   :  { %s751_s16 = smov 0   ;;  %s753_s17 = smov 0  }
   0x4   :  { %s755_s18 = smov 0   ;;  %s757_s19 = smov 0  }
   0x5 LB: > { %s489_s20 = sadd.s32 4294967295, %s712_s19   ;;  %s25_s21 = sadd.s32 1, %s704_s17  ;;  %s712_s19 = sphi %s757_s19, %s16_s19   ;;  %s708_s18 = sphi %s755_s18, %s940_s18   ;;  %s704_s17 = sphi %s753_s17, %s939_s17   ;;  %s700_s16 = sphi %s751_s16, %s938_s16   ;;  %s696_s15 = sphi %s749_s15, %s937_s15   ;;  %s692_s14 = sphi %s747_s14, %s936_s14   ;;  %s688_s13 = sphi %s745_s13, %s935_s13   ;;  %s684_s12 = sphi %s743_s12, %s934_s12  }
   0x6   : > { %p26_p0 = scmp.ge.s32.totalorder %s25_s21, 2  ;;  %s28_s22 = sadd.s32 1, %s708_s18 }
   0x7   : > { %s61_s23 = sadd.s32 1, %s692_s14  ;;  %p68_p1 = scmp.ne.s32.totalorder %s692_s14, %s688_s13 }
   0x8   : > { %s942_s21 = smov (%p26_p0, %s25_s21), 0  ;;  %s944_s22 = smov (!%p26_p0, %s28_s22), %s708_s18 }
   0x9   : > { %s58_s24 = ssub.s32 %s704_s17, %s942_s21  ;;  %p69_p2 = scmp.eq.s32.totalorder %s712_s19, 0 }
   0xa   : > { %p30_p3 = scmp.ge.s32.totalorder %s944_s22, 4  ;;  %p59_p4 = scmp.eq.s32.totalorder %s58_s24, 0 }
   0xb   : > { %p793_p5 = por %p69_p2, %p68_p1  ;;  %p74_p6 = scmp.ne.s32.totalorder %s688_s13, %s684_s12 }
   0xc   : > { %s946_s22 = smov (%p30_p3, %s944_s22), 0  ;;  %p75_p7 = scmp.eq.s32.totalorder %s489_s20, 0 }
   0xd   : > { %s801_s26 = scalar_select %p59_p4, %s692_s14, %s61_s23  }
   0xe   : > { %p529_p8 = scmp.lt.s32.totalorder %s712_s19, 8  ;;  %s157_s27 = sand.u32 1, %s692_s14  }
   0xf   : > { %p805_p9 = por %p75_p7, %p74_p6  ;;  %s493_s29 = sshll.u32 %s157_s27, 4 }
  0x10   : > { %s508_s30 = sshll.u32 %s704_s17, 8  ;;  %s161_s7 = scalar_lea.vmem [#allocation5], %s493_s29 }
  0x11   : > { %s813_s6 = scalar_lea.hbm %s928_s1, %s508_s30  ;;  %s168_s8 = sshll.u32 %s161_s7, 4  ;;  %s821_s8 = int_to_ptr.vmem [resolvable:$true] %s168_s8 }
  0x12   : > { %p817_p10 = pnand %p529_p8, %p793_p5  ;;  %s823_s10 = scalar_lea.sflag [#allocation6], %s157_s27 }
  0x13   : > { %s616_s11 = scalar_lea.hbm %s813_s6, 256  ;;  %s621_s23 = scalar_lea.hbm %s928_s1, 512 }
  0x14   : > { %p617_p11 = scmp.ne.s32.totalorder %s813_s6, %s616_s11  ;;  %p618_p12 = pneg %p817_p10 }
  0x15   : > { %p622_p1 = scmp.lt.u32.totalorder %s813_s6, %s928_s1  ;;  %p623_p2 = scmp.lt.u32.totalorder %s621_s23, %s616_s11 }
  0x16   : > { %p619_p13 = pnand %p618_p12, %p617_p11  ;;  %p625_p4 = scmp.lt.u32.totalorder %s616_s11, %s813_s6 }
  0x17   : > { %p624_p3 = por %p623_p2, %p622_p1 }
  0x18   : > { %p620_p0 = pneg %p619_p13 }
  0x19   : > { %p626_p5 = por %p625_p4, %p624_p3 }
  0x1b   : > { %p627_p6 = pnand %p626_p5, %p620_p0 }
  0x1d   : > { %630 = shalt.err (!%p627_p6)
}
  0x1e   : > { %s631_s27 = scalar_lea.vmem %s821_s8, 256  ;;  %s714_s29 = smov [#allocation5]  }
  0x1f   : > { %p632_p7 = scmp.ne.s32.totalorder %s821_s8, %s631_s27  ;;  %s636_s30 = sshll.u32 %s714_s29, 4  ;;  %s637_s30 = int_to_ptr.vmem [resolvable:$false] %s636_s30 }
  0x20   : > { %s638_s4 = scalar_lea.vmem %s637_s30, 512  ;;  %p639_p13 = scmp.lt.s32.totalorder %s821_s8, %s637_s30 }
  0x21   : > { %p634_p8 = pnand %p632_p7, %p618_p12  ;;  %p640_p1 = scmp.lt.s32.totalorder %s638_s4, %s631_s27 }
  0x23   : > { %p635_p11 = pneg %p634_p8  ;;  %p641_p2 = por %p640_p1, %p639_p13 }
  0x25   : > { %p642_p3 = pnand %p641_p2, %p635_p11 }
  0x27   : > { %645 = shalt.err (!%p642_p3)
}
  0x28   : > { %s715_s5 = smov 128   ;;  %s716_s7 = smov 8  }
  0x29   : > { %528 = dma.hbm_to_vmem [thread:$0]  (!%p817_p10), %s813_s6, 256, %s821_s8, %s823_s10, %s715_s5, %s715_s5, %s716_s7  }
  0x2a   : > { %p496_p12 = scmp.ge.s32.totalorder %s712_s19, 1  ;;  %p183_p0 = scmp.lt.s32.totalorder %s712_s19, 9 }
  0x2c   : > { %p184_p4 = pnand %p496_p12, %p183_p0 }
  0x2d   : > { %s189_s11 = sand.u32 (!%p184_p4), 1, %s688_s13  }
  0x2e   : > { %187 = sbr.rel (%p184_p4) target bundleno = 1068 (0x42c), region = 32  ;;  %s854_s12 = sshll.u32 (!%p184_p4), %s189_s11, 4 }
  0x2f   : > { %s190_s20 = scalar_lea.sflag (!%p184_p4), [#allocation6], %s189_s11  ;;  %s193_s23 = scalar_lea.vmem (!%p184_p4), [#allocation5], %s854_s12 }
  0x35   : > { %679 = dma.done.wait (%p805_p9), %s190_s20, 256  }
  0x36   : > { %681 = vsyncadd (%p805_p9), %s190_s20, 4294967040  ;;  %p223_p10 = scmp.lt.s32.totalorder %s700_s16, 3  ;;  %p501_p9 = scmp.ne.s32.totalorder %s696_s15, 0 }
  0x37   : > { %vm242_vm0 = vcmask (!%p501_p9), 523264   ;;  %vm251_vm1 = vcmask (!%p501_p9), 7168   ;;  %v717_v3 = vmov (!%p501_p9), -inf   ;;  %v718_v4 = vmov (!%p501_p9), 0.0  }
  0x38   : > { %s948_s16 = smov (!%p223_p10, %s700_s16), 3  ;;  %239 = sbr.rel (%p501_p9) target bundleno = 223 (0xdf), region = 40 }
  0x39   : > { %s863_s6 = sshll.u32 %s948_s16, 3  ;;  %252 = vst.msk [vmem:[#allocation3] sm:$0xff] (!%p501_p9), %vm251_vm1, %v717_v3  ;;  %253 = vst.msk [vmem:[#allocation4] sm:$0xff] (!%p501_p9), %vm251_vm1, %v718_v4 }
  0x3a   : > { %s226_s10 = scalar_lea.vmem %s927_s0, %s863_s6  ;;  %s231_s27 = scalar_lea.vmem %s929_s2, %s863_s6 }
  0x3b   : > { %s235_s30 = scalar_lea.vmem %s930_s3, %s863_s6  ;;  %v240_v0 = vld [vmem:[%s226_s10] sm:$0xff] (!%p501_p9) }
  0x3c   : > { %v241_v1 = vmul.f32 (!%p501_p9), %v240_v0, %v240_v0 }
  0x3e   : > { %v243_v2 = vsel (!%p501_p9), %vm242_vm0, %v241_v1, 0.0 }
  0x3f   : > { %244 = vadd.xlane.f32.xlu0 %v243_v2 }
  0xcc   : > { %v245_v5 = vpop.xlane.xlu0 %244 }
  0xcd   : > { %v246_v6 = vmax.f32 %v245_v5, 1e-08 }
  0xcf   : > { %602 = vrsqrt.f32 %v246_v6 }
  0xd9   : > { %v603_v7 = vpop.eup %602 }
  0xda   : > { %v248_v8 = vmul.f32 2.0, %v603_v7 }
  0xdc   : > { %v249_v9 = vmul.f32 %v248_v8, %v240_v0 }
  0xde   : > { %250 = vst.msk [vmem:[#allocation2] sm:$0xff] %vm242_vm0, %v249_v9 }
  0xdf PF: > { %v254_v10 = vld [vmem:[%s193_s23] sm:$0xff]  ;;  %vm258_vm2 = vcmask 523264   ;;  %v255_v11 = vld [vmem:[%s193_s23 + $0x8] sm:$0xff]  ;;  %v719_v16 = vmov 0.0|0.0   ;;  %vm720_vm3 = vmmov 0   ;;  %v721_v17 = vmov 0.0  }
  0xe0   : > { %v256_v12 = vmul.f32 %v254_v10, %v254_v10  ;;  %v257_v13 = vmul.f32 %v255_v11, %v255_v11  ;;  %519 = vmatprep.subr.bf16.mxu0 %v719_v16  ;;  %516 = vmatprep.mubr.msk.f32.mxu0 %vm720_vm3, %v721_v17  ;;  %vm521_vm4 = vmpackc.low %vm258_vm2, %vm258_vm2  ;;  %vm352_vm5 = vcmask 130048   ;;  %v722_v31 = vmov 0   ;;  %v351_v32 = vld [vmem:[#allocation3] sm:$0xff]  ;;  %v360_v43 = vld [vmem:[#allocation4] sm:$0xff]  ;;  %p505_p5 = scmp.ne.s32.totalorder %s696_s15, 1 }
  0xe1   : > { %604 = vset.pattern.permute.xlu1 %v722_v31  ;;  %605 = vset.pattern.permute.xlu0 %v722_v31  ;;  %vm374_vm6 = vcmask 7168   ;;  %v386_v51 = vld [vmem:[%s231_s27] sm:$0xff] (!%p505_p5) }
  0xe2   : > { %v259_v14 = vsel %vm258_vm2, %v256_v12, 0.0  ;;  %v262_v15 = vsel %vm258_vm2, %v257_v13, 0.0 }
  0xe3   : > { %260 = vadd.xlane.f32.xlu0 %v259_v14 }
  0xe5   : > { %v271_v27 = vld [vmem:[#allocation2] sm:$0xff] }
  0xe7   : > { %263 = vadd.xlane.f32.xlu0 %v262_v15 }
 0x170   : > { %v261_v18 = vpop.xlane.xlu0 %260 }
 0x171   : > { %v265_v19 = vmax.f32 %v261_v18, 1e-08 }
 0x173   : > { %606 = vrsqrt.f32 %v265_v19 }
 0x174   : > { %v264_v20 = vpop.xlane.xlu0 %263 }
 0x175   : > { %v266_v21 = vmax.f32 %v264_v20, 1e-08 }
 0x177   : > { %608 = vrsqrt.f32 %v266_v21 }
 0x17d   : > { %v607_v22 = vpop.eup %606 }
 0x17e   : > { %v269_v24 = vmul.f32 %v607_v22, %v254_v10 }
 0x181   : > { %v609_v23 = vpop.eup %608 }
 0x182   : > { %v270_v25 = vmul.f32 %v609_v23, %v255_v11 }
 0x184   : > { %v520_v26 = vpack.c.bf16 %v270_v25, %v269_v24 }
 0x186   : > { %522 = vmatpush3.bf16.xpose.msk.msra.mxu0 %vm521_vm4, %v520_v26 }
 0x18d   : > { %517 = vmatmul.mubr.msk.f32.vlgmr.msra.gmra.mrb[0].mxu0 %vm258_vm2, %v271_v27 }
 0x260   : > { %v347_v28 = vpop.f32.mrb[0].mxu0 }
 0x261   : > { %v518_v29 = vpop.f32.mrb[1].mxu0  ;;  %v353_v30 = vsel %vm352_vm5, %v347_v28, -inf }
 0x262   : > { %354 = vmax.xlane.f32.xlu1 %v353_v30 }
 0x2ef   : > { %v355_v33 = vpop.xlane.xlu1 %354 }
 0x2f0   : > { %v356_v34 = vmax.f32 %v351_v32, %v355_v33 }
 0x2f2   : > { %v357_v35 = vsub.f32 %v351_v32, %v356_v34  ;;  %376 = vst.msk [vmem:[#allocation3] sm:$0xff] %vm374_vm6, %v356_v34  ;;  %364 = vperm.xlu1 %604, %v356_v34  }
 0x2f4   : > { %v358_v41 = vmul.f32 1.442695, %v357_v35 }
 0x2f9   : > { %v381_v49 = vld [vmem:[#allocation3] sm:$0xff] (!%p505_p5) }
 0x371   : > { %v365_v36 = vpop.permute.xlu1 %364 }
 0x372   : > { %v367_v37 = vsub.f32 %v347_v28, %v365_v36 }
 0x374   : > { %v368_v38 = vmul.f32 1.442695, %v367_v37 }
 0x376   : > { %610 = vpow2.f32 %v368_v38 }
 0x377   : > { %612 = vpow2.f32 %v358_v41 }
 0x380   : > { %v611_v39 = vpop.eup %610 }
 0x381   : > { %v370_v40 = vsel %vm352_vm5, %v611_v39, 0.0  ;;  %v613_v42 = vpop.eup %612 }
 0x382   : > { %371 = vadd.xlane.f32.xlu0 %v370_v40  ;;  %v361_v44 = vmul.f32 %v613_v42, %v360_v43 }
 0x40c   : > { %380 = sbr.rel (%p505_p5) target bundleno = 1068 (0x42c), region = 44 }
 0x40f   : > { %v372_v45 = vpop.xlane.xlu0 %371 }
 0x410   : > { %v373_v46 = vadd.f32 %v372_v45, %v361_v44 }
 0x412   : > { %375 = vst.msk [vmem:[#allocation4] sm:$0xff] %vm374_vm6, %v373_v46 }
 0x419   : > { %v382_v47 = vld [vmem:[#allocation4] sm:$0xff] }
 0x41a   : > { %614 = vlog2.f32 %v382_v47 }
 0x424   : > { %v615_v48 = vpop.eup %614 }
 0x425   : > { %v384_v50 = vmul.f32 0.6931472, %v615_v48 }
 0x427   : > { %v385_v52 = vadd.f32 %v384_v50, %v381_v49 }
 0x429   : > { %v387_v53 = vsub.f32 %v385_v52, %v386_v51 }
 0x42b   : > { %388 = vst.msk [vmem:[%s235_s30] sm:$0xff] %vm374_vm6, %v387_v53 }
 0x42c PF: > { %s16_s19 = sadd.s32 1, %s712_s19   ;;  %s934_s12 = smov %s688_s13 }
 0x42d   : > { %p13_p6 = scmp.ge.s32.totalorder %s16_s19, 10   ;;  %s935_s13 = smov %s692_s14 }
 0x42e   : > { %s936_s14 = smov %s801_s26  ;;  %s937_s15 = smov %s704_s17 }
 0x42f   : > { %s938_s16 = smov %s708_s18  ;;  %s939_s17 = smov %s942_s21 }
 0x430   : > { %s940_s18 = smov %s946_s22  ;;  %15 = sbr.rel (!%p13_p6) target bundleno = 5 (0x5), region = 86 }
 0x437   :  { %408 = vsyncpa [#allocation6], 1 }
 0x438   :  { %410 = vsyncpa [#allocation6 + $0x1], 1 }

</bundles_post_ra>
